<compile_context>
chip_gen: v6e
topology: v6e:2x2x1
jax: 0.10.0
libtpu: 0.0.40
codegen_flags: <defaults>
</compile_context>

<pallas_src>
import functools

import jax
import jax.numpy as jnp
from jax.experimental import pallas as pl
from jax.experimental.pallas import tpu as pltpu

LANE = 128     # lane width — pad feature/output dims to multiples of this
SUBLANE = 8    # sublane width — batch tiles are multiples of this (when tiled)


def _round_up(n, m):
    return ((n + m - 1) // m) * m


def _num_tensorcores():
    """Best-effort TensorCores-per-chip (2 on v7x, 1 on v5e/v6e). Safe fallback 1."""
    try:
        info = pltpu.get_tpu_info()
        for attr in ("num_cores", "core_count", "num_tensorcores"):
            v = getattr(info, attr, None)
            if isinstance(v, int) and v >= 1:
                return v
    except Exception:
        pass
    try:
        v = getattr(jax.devices()[0], "num_cores", None)
        if isinstance(v, int) and v >= 1:
            return v
    except Exception:
        pass
    return 1


def pack_params(params, layer_num=3, dtype=jnp.bfloat16):
    """One-time preprocessing (outside the per-call hot path).

    W_eff = W1 - W2 per layer, transposed to [in, out].  fc1 keeps its true
    input width n_in (no 128-wide K padding); hidden/output widths are padded
    to a common lane-dense P (multiple of 128).  Biases are stacked into one
    [L, P] f32 operand.  Zero padding is exact.
    """
    n_layers = 3 if layer_num > 2 else 2
    names = ["fc1", "fc2", "fc3"][:n_layers]

    w_eff = [(params[f"{nm}_W1"] - params[f"{nm}_W2"]).T for nm in names]  # [in, out]
    n_in = w_eff[0].shape[0]
    dims_out = [w.shape[1] for w in w_eff]
    p = max(_round_up(d, LANE) for d in dims_out)      # common padded width

    padded_ws = []
    for idx, w in enumerate(w_eff):
        in_dim = n_in if idx == 0 else p               # fc1: un-padded K
        pad = ((0, in_dim - w.shape[0]), (0, p - w.shape[1]))
        padded_ws.append(jnp.pad(w, pad).astype(dtype))

    bias_stack = jnp.stack(
        [jnp.pad(params[f"{nm}_bias"], (0, p - params[f"{nm}_bias"].shape[0]))
         for nm in names]
    ).astype(jnp.float32)                              # [L, P], f32 accum

    return {
        "weights": tuple(padded_ws),
        "biases": bias_stack,
        "n_in": n_in,
        "n_out": dims_out[-1],
        "p": p,
        "n_layers": n_layers,
        "dtype": dtype,
    }


def _mlp_kernel(x_ref, *refs, n_layers):
    """Fused 2/3-layer MLP; all operands resident in VMEM for the batch tile."""
    w_refs = refs[:n_layers]
    b_ref = refs[n_layers]
    o_ref = refs[n_layers + 1]
    w_dtype = w_refs[0].dtype

    h = x_ref[...].astype(w_dtype)
    for layer in range(n_layers):
        h = jnp.dot(h, w_refs[layer][...], preferred_element_type=jnp.float32)
        h = h + b_ref[layer:layer + 1, :]              # [1, P] broadcast add
        if layer < n_layers - 1:
            h = jnp.maximum(h, 0.0)                    # ReLU
            h = h.astype(w_dtype)                      # feed next MXU pass
    o_ref[...] = h.astype(o_ref.dtype)


def make_forward(packed, max_batch_tile=1024, num_tensorcores=None):
    """Build a jitted forward(x) from packed (pre-processed) parameters."""
    n_layers = packed["n_layers"]
    p = packed["p"]
    n_in, n_out = packed["n_in"], packed["n_out"]
    weights, biases = packed["weights"], packed["biases"]
    w_bytes = sum(int(w.size) * w.dtype.itemsize for w in weights)
    b_bytes = int(biases.size) * biases.dtype.itemsize
    if num_tensorcores is None:
        num_tensorcores = _num_tensorcores()

    kernel = functools.partial(_mlp_kernel, n_layers=n_layers)

    @jax.jit
    def forward(x):
        b = x.shape[0]

        # --- generation-aware batch tiling --------------------------------
        b8 = _round_up(b, SUBLANE)
        n_prog = pl.cdiv(b8, max_batch_tile)           # cap tile size (VMEM)
        if num_tensorcores > 1 and b >= 4 * SUBLANE * num_tensorcores:
            n_prog = max(n_prog, num_tensorcores)      # shard across TCs (v7x)
        if n_prog <= 1:
            tb, b_pad = b, b                           # full-array block, no pad
        else:
            tb = _round_up(pl.cdiv(b8, n_prog), SUBLANE)   # even split
            n_prog = pl.cdiv(b8, tb)
            if n_prog <= 1:
                tb, b_pad = b, b
            else:
                b_pad = tb * n_prog

        x_in = x if b_pad == b else jnp.pad(x, ((0, b_pad - b), (0, 0)))
        grid = (b_pad // tb,)

        flops = 2 * b_pad * (n_in * p + (n_layers - 1) * p * p)
        bytes_accessed = (int(x_in.size) * x_in.dtype.itemsize
                          + w_bytes + b_bytes + b_pad * p * 4)

        out = pl.pallas_call(
            kernel,
            out_shape=jax.ShapeDtypeStruct((b_pad, p), jnp.float32),
            grid=grid,
            in_specs=[pl.BlockSpec((tb, n_in), lambda i: (i, 0))]
                     + [pl.BlockSpec(w.shape, lambda i: (0, 0)) for w in weights]
                     + [pl.BlockSpec(biases.shape, lambda i: (0, 0))],
            out_specs=pl.BlockSpec((tb, p), lambda i: (i, 0)),
            compiler_params=pltpu.CompilerParams(
                dimension_semantics=("parallel",),
                vmem_limit_bytes=32 * 1024 * 1024),
            cost_estimate=pl.CostEstimate(
                flops=flops, transcendentals=0, bytes_accessed=bytes_accessed),
        )(x_in, *weights, biases)

        return out[:b, :n_out]

    return forward


def customnet_forward_ref(x, params, layer_num=3):
    """Pure-JAX reference (unpadded, unpacked, f32)."""
    h = x @ (params["fc1_W1"] - params["fc1_W2"]).T + params["fc1_bias"]
    h = jnp.maximum(h, 0.0)
    h = h @ (params["fc2_W1"] - params["fc2_W2"]).T + params["fc2_bias"]
    if layer_num > 2:
        h = jnp.maximum(h, 0.0)
        h = h @ (params["fc3_W1"] - params["fc3_W2"]).T + params["fc3_bias"]
    return h


def init_params(key, inputn, n1, n2, n3):
    # Deterministic synthetic init (the PyTorch module inits to zeros and
    # relies on reset_w / training; zeros would make the test vacuous).
    ks = jax.random.split(key, 9)
    return {
        "fc1_W1": jax.random.normal(ks[0], (n1, inputn), jnp.float32) * 0.1,
        "fc1_W2": jax.random.normal(ks[1], (n1, inputn), jnp.float32) * 0.1,
        "fc2_W1": jax.random.normal(ks[2], (n2, n1), jnp.float32) * 0.1,
        "fc2_W2": jax.random.normal(ks[3], (n2, n1), jnp.float32) * 0.1,
        "fc3_W1": jax.random.normal(ks[4], (n3, n2), jnp.float32) * 0.1,
        "fc3_W2": jax.random.normal(ks[5], (n3, n2), jnp.float32) * 0.1,
        "fc1_bias": jax.random.normal(ks[6], (n1,), jnp.float32) * 0.1,
        "fc2_bias": jax.random.normal(ks[7], (n2,), jnp.float32) * 0.1,
        "fc3_bias": jax.random.normal(ks[8], (n3,), jnp.float32) * 0.1,
    }


if __name__ == "__main__":
    key = jax.random.PRNGKey(0)
    batch, inputn, n1, n2, n3 = 8, 32, 64, 32, 16

    kx, kp = jax.random.split(key)
    x = jax.random.normal(kx, (batch, inputn), jnp.float32)
    params = init_params(kp, inputn, n1, n2, n3)

    # 3-layer path, f32 weights (tight tolerance).
    packed3_f32 = pack_params(params, layer_num=3, dtype=jnp.float32)
    fwd3_f32 = make_forward(packed3_f32)
    out3 = jax.block_until_ready(fwd3_f32(x))
    ref3 = customnet_forward_ref(x, params, layer_num=3)
    assert out3.shape == (batch, n3), out3.shape
    assert jnp.allclose(out3, ref3, atol=1e-5, rtol=1e-5), \
        float(jnp.max(jnp.abs(out3 - ref3)))

    # 3-layer path, default bf16 weights (perf default; loose tolerance).
    packed3_bf16 = pack_params(params, layer_num=3)
    fwd3_bf16 = make_forward(packed3_bf16)
    out3b = jax.block_until_ready(fwd3_bf16(x))
    assert out3b.shape == (batch, n3), out3b.shape
    assert jnp.allclose(out3b, ref3, atol=5e-2, rtol=5e-2), \
        float(jnp.max(jnp.abs(out3b - ref3)))

    # 2-layer path (layer_num == 2), f32.
    packed2 = pack_params(params, layer_num=2, dtype=jnp.float32)
    fwd2 = make_forward(packed2)
    out2 = jax.block_until_ready(fwd2(x))
    ref2 = customnet_forward_ref(x, params, layer_num=2)
    assert out2.shape == (batch, n2), out2.shape
    assert jnp.allclose(out2, ref2, atol=1e-5, rtol=1e-5), \
        float(jnp.max(jnp.abs(out2 - ref2)))

    # Odd batch (not a multiple of 8) — exercises the full-array-block path.
    x5 = jax.random.normal(jax.random.PRNGKey(1), (5, inputn), jnp.float32)
    out5 = jax.block_until_ready(fwd3_f32(x5))
    ref5 = customnet_forward_ref(x5, params, layer_num=3)
    assert out5.shape == (5, n3), out5.shape
    assert jnp.allclose(out5, ref5, atol=1e-5, rtol=1e-5), \
        float(jnp.max(jnp.abs(out5 - ref5)))

    print("KERNEL_OK")
</pallas_src>

<mosaic_0001>
module attributes {stable_mosaic.version = 11 : i64} {
  func.func @_mlp_kernel(%arg0: i32, %arg1: memref<8x32xf32, #tpu.memory_space<vmem>>, %arg2: memref<32x128xf32, #tpu.memory_space<vmem>>, %arg3: memref<128x128xf32, #tpu.memory_space<vmem>>, %arg4: memref<128x128xf32, #tpu.memory_space<vmem>>, %arg5: memref<3x128xf32, #tpu.memory_space<vmem>>, %arg6: memref<8x128xf32, #tpu.memory_space<vmem>>) attributes {dimension_semantics = [#tpu.dimension_semantics<parallel>], iteration_bounds = array<i64: 1>, scalar_prefetch = 0 : i64, scratch_operands = 0 : i64, tpu.core_type = #tpu.core_type<tc>, window_params = [{transform_indices = @transform_0, window_bounds = array<i64: 8, 32>}, {pipeline_mode = #tpu.pipeline_mode<synchronous>, transform_indices = @transform_1, window_bounds = array<i64: 32, 128>}, {pipeline_mode = #tpu.pipeline_mode<synchronous>, transform_indices = @transform_2, window_bounds = array<i64: 128, 128>}, {pipeline_mode = #tpu.pipeline_mode<synchronous>, transform_indices = @transform_3, window_bounds = array<i64: 128, 128>}, {pipeline_mode = #tpu.pipeline_mode<synchronous>, transform_indices = @transform_4, window_bounds = array<i64: 3, 128>}, {transform_indices = @transform_5, window_bounds = array<i64: 8, 128>}]} {
    %c0 = arith.constant 0 : index
    %c0_0 = arith.constant 0 : index
    %0 = vector.load %arg1[%c0, %c0_0] : memref<8x32xf32, #tpu.memory_space<vmem>>, vector<8x32xf32>
    %c0_1 = arith.constant 0 : index
    %c0_2 = arith.constant 0 : index
    %1 = vector.load %arg2[%c0_1, %c0_2] : memref<32x128xf32, #tpu.memory_space<vmem>>, vector<32x128xf32>
    %cst = arith.constant dense<0.000000e+00> : vector<8x128xf32>
    %2 = tpu.matmul %0, %1, %cst {dimension_numbers = #tpu.dot_dimension_numbers<[1], [0], [0], [1], [0, 0, 1, 1], [], []>} : vector<8x32xf32>, vector<32x128xf32>, vector<8x128xf32> -> vector<8x128xf32>
    %c0_3 = arith.constant 0 : index
    %c0_4 = arith.constant 0 : index
    %3 = vector.load %arg5[%c0_3, %c0_4] : memref<3x128xf32, #tpu.memory_space<vmem>>, vector<1x128xf32>
    %4 = vector.broadcast %3 : vector<1x128xf32> to vector<8x128xf32>
    %5 = arith.addf %2, %4 : vector<8x128xf32>
    %cst_5 = arith.constant 0.000000e+00 : f32
    %6 = vector.broadcast %cst_5 : f32 to vector<8x128xf32>
    %7 = arith.maximumf %5, %6 : vector<8x128xf32>
    %c0_6 = arith.constant 0 : index
    %c0_7 = arith.constant 0 : index
    %8 = vector.load %arg3[%c0_6, %c0_7] : memref<128x128xf32, #tpu.memory_space<vmem>>, vector<128x128xf32>
    %cst_8 = arith.constant dense<0.000000e+00> : vector<8x128xf32>
    %9 = tpu.matmul %7, %8, %cst_8 {dimension_numbers = #tpu.dot_dimension_numbers<[1], [0], [0], [1], [0, 0, 1, 1], [], []>} : vector<8x128xf32>, vector<128x128xf32>, vector<8x128xf32> -> vector<8x128xf32>
    %c1 = arith.constant 1 : index
    %c0_9 = arith.constant 0 : index
    %10 = vector.load %arg5[%c1, %c0_9] : memref<3x128xf32, #tpu.memory_space<vmem>>, vector<1x128xf32>
    %11 = vector.broadcast %10 : vector<1x128xf32> to vector<8x128xf32>
    %12 = arith.addf %9, %11 : vector<8x128xf32>
    %cst_10 = arith.constant 0.000000e+00 : f32
    %13 = vector.broadcast %cst_10 : f32 to vector<8x128xf32>
    %14 = arith.maximumf %12, %13 : vector<8x128xf32>
    %c0_11 = arith.constant 0 : index
    %c0_12 = arith.constant 0 : index
    %15 = vector.load %arg4[%c0_11, %c0_12] : memref<128x128xf32, #tpu.memory_space<vmem>>, vector<128x128xf32>
    %cst_13 = arith.constant dense<0.000000e+00> : vector<8x128xf32>
    %16 = tpu.matmul %14, %15, %cst_13 {dimension_numbers = #tpu.dot_dimension_numbers<[1], [0], [0], [1], [0, 0, 1, 1], [], []>} : vector<8x128xf32>, vector<128x128xf32>, vector<8x128xf32> -> vector<8x128xf32>
    %c2 = arith.constant 2 : index
    %c0_14 = arith.constant 0 : index
    %17 = vector.load %arg5[%c2, %c0_14] : memref<3x128xf32, #tpu.memory_space<vmem>>, vector<1x128xf32>
    %18 = vector.broadcast %17 : vector<1x128xf32> to vector<8x128xf32>
    %19 = arith.addf %16, %18 : vector<8x128xf32>
    %c0_15 = arith.constant 0 : index
    %c0_16 = arith.constant 0 : index
    %20 = vector.load %arg6[%c0_15, %c0_16] : memref<8x128xf32, #tpu.memory_space<vmem>>, vector<8x128xf32>
    tpu.vector_store %arg6[%c0_15, %c0_16], %19 {strides = array<i32>} : memref<8x128xf32, #tpu.memory_space<vmem>>, vector<8x128xf32>,
    return
  }
  func.func @transform_0(%arg0: i32) -> (i32, i32) {
    %c0_i32 = arith.constant 0 : i32
    %c0_i32_0 = arith.constant 0 : i32
    return %arg0, %c0_i32 : i32, i32
  }
  func.func @transform_1(%arg0: i32) -> (i32, i32) {
    %c0_i32 = arith.constant 0 : i32
    %c0_i32_0 = arith.constant 0 : i32
    %c0_i32_1 = arith.constant 0 : i32
    return %c0_i32, %c0_i32_0 : i32, i32
  }
  func.func @transform_2(%arg0: i32) -> (i32, i32) {
    %c0_i32 = arith.constant 0 : i32
    %c0_i32_0 = arith.constant 0 : i32
    %c0_i32_1 = arith.constant 0 : i32
    return %c0_i32, %c0_i32_0 : i32, i32
  }
  func.func @transform_3(%arg0: i32) -> (i32, i32) {
    %c0_i32 = arith.constant 0 : i32
    %c0_i32_0 = arith.constant 0 : i32
    %c0_i32_1 = arith.constant 0 : i32
    return %c0_i32, %c0_i32_0 : i32, i32
  }
  func.func @transform_4(%arg0: i32) -> (i32, i32) {
    %c0_i32 = arith.constant 0 : i32
    %c0_i32_0 = arith.constant 0 : i32
    %c0_i32_1 = arith.constant 0 : i32
    return %c0_i32, %c0_i32_0 : i32, i32
  }
  func.func @transform_5(%arg0: i32) -> (i32, i32) {
    %c0_i32 = arith.constant 0 : i32
    %c0_i32_0 = arith.constant 0 : i32
    return %arg0, %c0_i32 : i32, i32
  }
}

</mosaic_0001>

<bundles_post_ra>
// kernel: forward.1
= control target key start
LH: loop header
LB: loop body
LE: loop exit
PB: predicated region body
PF: predicated region fallthrough
CT: control target
= control target key end

     0   :  { %10 = vsyncpa [#allocation3], 0  ;;  %s715_s0 = inlined_call_operand.hbm [shape: f32[8,32], index: 0, kind: input, shape index: {}]   ;;  %s716_s1 = inlined_call_operand.hbm [shape: f32[32,128], index: 1, kind: input, shape index: {}]   ;;  %s717_s2 = inlined_call_operand.hbm [shape: f32[128,128], index: 2, kind: input, shape index: {}]   ;;  %s718_s3 = inlined_call_operand.hbm [shape: f32[128,128], index: 3, kind: input, shape index: {}]   ;;  %s719_s4 = inlined_call_operand.vmem [shape: f32[3,128], index: 4, kind: input, shape index: {}]   ;;  %s720_s5 = inlined_call_operand.hbm [shape: f32[8,128], index: 5, kind: output, shape index: {}]  }
   0x1   :  { %11 = vsyncpa [#allocation6], 0 }
   0x2   :  { %12 = vsyncpa [#allocation9], 0 }
   0x3   :  { %13 = vsyncpa [#allocation4], 0  ;;  %s601_s18 = smov [#allocation5]  }
   0x4   :  { %s29_s19 = sshll.u32 %s601_s18, 4  ;;  %s30_s19 = int_to_ptr.vmem [resolvable:$true] %s29_s19 }
   0x5   :  { %s501_s20 = scalar_lea.vmem %s30_s19, 512  ;;  %p506_p1 = scmp.lt.s32.totalorder %s30_s19, %s30_s19 }
   0x6   :  { %p502_p0 = scmp.ne.s32.totalorder %s30_s19, %s501_s20  ;;  %p507_p2 = scmp.lt.s32.totalorder %s501_s20, %s501_s20 }
   0x8   :  { %p508_p3 = por %p507_p2, %p506_p1 }
   0xa   :  { %p509_p4 = pnand %p508_p3, %p502_p0 }
   0xc   :  { %512 = shalt.err (!%p509_p4)
}
   0xd   :  { %s602_s21 = smov 128   ;;  %s603_s22 = smov 8  }
   0xe   :  { %35 = dma.hbm_to_vmem [thread:$0]  %s716_s1, 512, %s30_s19, [#allocation6], %s602_s21, %s602_s21, %s603_s22  }
   0xf   :  { %s604_s25 = smov [#allocation2]   ;;  %s605_s27 = smov [#allocation7]  }
  0x10   :  { %s20_s26 = sshll.u32 %s604_s25, 4  ;;  %s41_s28 = sshll.u32 %s605_s27, 4  ;;  %s21_s26 = int_to_ptr.vmem [resolvable:$true] %s20_s26  ;;  %s42_s28 = int_to_ptr.vmem [resolvable:$true] %s41_s28 }
  0x11   :  { %s521_s29 = scalar_lea.vmem %s21_s26, 128  ;;  %p526_p6 = scmp.lt.s32.totalorder %s21_s26, %s21_s26 }
  0x12   :  { %p522_p5 = scmp.ne.s32.totalorder %s21_s26, %s521_s29  ;;  %p527_p7 = scmp.lt.s32.totalorder %s521_s29, %s521_s29 }
  0x14   :  { %p528_p8 = por %p527_p7, %p526_p6 }
  0x16   :  { %p529_p9 = pnand %p528_p8, %p522_p5 }
  0x18   :  { %532 = shalt.err (!%p529_p9)
}
  0x19   :  { %23 = dma.hbm_to_vmem [thread:$0]  %s715_s0, 128, %s21_s26, [#allocation3]  }
  0x1a   :  { %s541_s7 = scalar_lea.vmem %s42_s28, 2048  ;;  %p546_p11 = scmp.lt.s32.totalorder %s42_s28, %s42_s28 }
  0x1b   :  { %p542_p10 = scmp.ne.s32.totalorder %s42_s28, %s541_s7  ;;  %p547_p12 = scmp.lt.s32.totalorder %s541_s7, %s541_s7 }
  0x1d   :  { %p548_p13 = por %p547_p12, %p546_p11 }
  0x1f   :  { %p549_p0 = pnand %p548_p13, %p542_p10 }
  0x21   :  { %552 = shalt.err (!%p549_p0)
}
  0x22   :  { %47 = dma.hbm_to_vmem [thread:$0]  %s717_s2, 2048, %s42_s28, [#allocation6], %s602_s21, %s602_s21, %s603_s22  }
  0x23   :  { %s606_s9 = smov [#allocation8]  }
  0x24   :  { %s53_s10 = sshll.u32 %s606_s9, 4  ;;  %s54_s10 = int_to_ptr.vmem [resolvable:$true] %s53_s10 }
  0x25   :  { %s561_s11 = scalar_lea.vmem %s54_s10, 2048  ;;  %p566_p2 = scmp.lt.s32.totalorder %s54_s10, %s54_s10 }
  0x26   :  { %p562_p1 = scmp.ne.s32.totalorder %s54_s10, %s561_s11  ;;  %p567_p3 = scmp.lt.s32.totalorder %s561_s11, %s561_s11 }
  0x28   :  { %p568_p4 = por %p567_p3, %p566_p2 }
  0x2a   :  { %p569_p5 = pnand %p568_p4, %p562_p1 }
  0x2c   :  { %572 = shalt.err (!%p569_p5)
}
  0x2d   :  { %59 = dma.hbm_to_vmem [thread:$0]  %s718_s3, 2048, %s54_s10, [#allocation9], %s602_s21, %s602_s21, %s603_s22  }
  0x2e   :  { %593 = dma.done.wait [#allocation3], 128  }
  0x2f   :  { %594 = vsyncadd [#allocation3], 4294967168 }
  0x30   :  { %595 = dma.done.wait [#allocation6], 2560  }
  0x31   :  { %596 = vsyncadd [#allocation6], 4294964736 }
  0x32   :  { %597 = dma.done.wait [#allocation9], 2048  }
  0x33   :  { %598 = vsyncadd [#allocation9], 4294965248  ;;  %v607_v0 = vmov 0.0   ;;  %vm608_vm0 = vmmov 0   ;;  %v78_v1 = vld [vmem:[#allocation5 + $0x18] sm:$0xff]  ;;  %v77_v2 = vld [vmem:[#allocation5 + $0x10] sm:$0xff] }
  0x34   :  { %403 = vmatprep.subr.mxu0 %v607_v0  ;;  %411 = vmatprep.mubr.msk.f32.mxu0 %vm608_vm0, %v607_v0  ;;  %v174_v3 = vld [vmem:[#allocation7 + $0x78] sm:$0xff]  ;;  %v76_v4 = vld [vmem:[#allocation5 + $0x8] sm:$0xff]  ;;  %v173_v5 = vld [vmem:[#allocation7 + $0x70] sm:$0xff]  ;;  %vm84_vm1 = vcmask 261120   ;;  %s609_s17 = smov [#allocation10]  }
  0x35   :  { %414 = vmatprep.subr.mxu1 %v607_v0  ;;  %446 = vmatprep.mubr.msk.f32.mxu1 %vm608_vm0, %v607_v0  ;;  %v172_v6 = vld [vmem:[#allocation7 + $0x68] sm:$0xff]  ;;  %v75_v7 = vld [vmem:[#allocation5] sm:$0xff]  ;;  %v74_v8 = vld [vmem:[#allocation2] sm:$0xff]  ;;  %s349_s18 = sshll.u32 %s609_s17, 4  ;;  %s350_s18 = int_to_ptr.vmem [resolvable:$true] %s349_s18 }
  0x36   :  { %404 = vmatpush3.msra.mxu0 %v78_v1  ;;  %415 = vmatpush3.msra.mxu1 %v174_v3  ;;  %v171_v9 = vld [vmem:[#allocation7 + $0x60] sm:$0xff]  ;;  %v170_v10 = vld [vmem:[#allocation7 + $0x58] sm:$0xff]  ;;  %v169_v11 = vld [vmem:[#allocation7 + $0x50] sm:$0xff]  ;;  %s573_s19 = scalar_lea.vmem %s350_s18, 128  ;;  %p578_p7 = scmp.lt.s32.totalorder %s350_s18, %s350_s18 }
  0x37   :  { %405 = vmatprep.subr.mxu0 %v607_v0  ;;  %416 = vmatprep.subr.mxu1 %v607_v0  ;;  %v168_v12 = vld [vmem:[#allocation7 + $0x48] sm:$0xff]  ;;  %v167_v13 = vld [vmem:[#allocation7 + $0x40] sm:$0xff]  ;;  %v166_v14 = vld [vmem:[#allocation7 + $0x38] sm:$0xff]  ;;  %p574_p6 = scmp.ne.s32.totalorder %s350_s18, %s573_s19  ;;  %p579_p8 = scmp.lt.s32.totalorder %s573_s19, %s573_s19 }
  0x38   :  { %406 = vmatpush3.msra.mxu0 %v77_v2  ;;  %417 = vmatpush3.msra.mxu1 %v173_v5  ;;  %v165_v15 = vld [vmem:[#allocation7 + $0x30] sm:$0xff]  ;;  %v164_v16 = vld [vmem:[#allocation7 + $0x28] sm:$0xff]  ;;  %v163_v17 = vld [vmem:[#allocation7 + $0x20] sm:$0xff] }
  0x39   :  { %407 = vmatprep.subr.mxu0 %v607_v0  ;;  %418 = vmatprep.subr.mxu1 %v607_v0  ;;  %v162_v18 = vld [vmem:[#allocation7 + $0x18] sm:$0xff]  ;;  %v161_v19 = vld [vmem:[#allocation7 + $0x10] sm:$0xff]  ;;  %v160_v20 = vld [vmem:[#allocation7 + $0x8] sm:$0xff]  ;;  %p580_p9 = por %p579_p8, %p578_p7 }
  0x3a   :  { %408 = vmatpush3.msra.mxu0 %v76_v4  ;;  %419 = vmatpush3.msra.mxu1 %v172_v6  ;;  %v159_v21 = vld [vmem:[#allocation7] sm:$0xff]  ;;  %v266_v22 = vld [vmem:[#allocation8 + $0x78] sm:$0xff]  ;;  %v265_v23 = vld [vmem:[#allocation8 + $0x70] sm:$0xff] }
  0x3b   :  { %409 = vmatprep.subr.mxu0 %v607_v0  ;;  %420 = vmatprep.subr.mxu1 %v607_v0  ;;  %v264_v24 = vld [vmem:[#allocation8 + $0x68] sm:$0xff]  ;;  %v263_v25 = vld [vmem:[#allocation8 + $0x60] sm:$0xff]  ;;  %v262_v26 = vld [vmem:[#allocation8 + $0x58] sm:$0xff]  ;;  %p581_p10 = pnand %p580_p9, %p574_p6 }
  0x3c   :  { %410 = vmatpush3.msra.mxu0 %v75_v7  ;;  %421 = vmatpush3.msra.mxu1 %v171_v9  ;;  %v261_v27 = vld [vmem:[#allocation8 + $0x50] sm:$0xff]  ;;  %v260_v28 = vld [vmem:[#allocation8 + $0x48] sm:$0xff]  ;;  %v259_v29 = vld [vmem:[#allocation8 + $0x40] sm:$0xff] }
  0x3d   :  { %412 = vmatmul.mubr.msk.f32.vlgmr.msra.gmra.mxu0 %vm84_vm1, %v74_v8  ;;  %422 = vmatprep.subr.mxu1 %v607_v0  ;;  %v258_v30 = vld [vmem:[#allocation8 + $0x38] sm:$0xff]  ;;  %v257_v31 = vld [vmem:[#allocation8 + $0x30] sm:$0xff]  ;;  %v256_v32 = vld [vmem:[#allocation8 + $0x28] sm:$0xff] }
  0x3e   :  { %449 = vmatprep.subr.mxu0 %v607_v0  ;;  %423 = vmatpush3.msra.mxu1 %v170_v10  ;;  %v255_v33 = vld [vmem:[#allocation8 + $0x20] sm:$0xff]  ;;  %v254_v34 = vld [vmem:[#allocation8 + $0x18] sm:$0xff]  ;;  %v253_v40 = vld [vmem:[#allocation8 + $0x10] sm:$0xff] }
  0x3f   :  { %481 = vmatprep.mubr.msk.f32.mxu0 %vm608_vm0, %v607_v0  ;;  %424 = vmatprep.subr.mxu1 %v607_v0  ;;  %v360_v35 = vld [vmem:[%s719_s4] ss:$0 sm:$0xff]  ;;  %v252_v41 = vld [vmem:[#allocation8 + $0x8] sm:$0xff]  ;;  %v251_v42 = vld [vmem:[#allocation8] sm:$0xff] }
  0x40   :  { %425 = vmatpush3.msra.mxu1 %v169_v11  ;;  %450 = vmatpush3.msra.mxu0 %v266_v22  ;;  %v362_v43 = vld [vmem:[%s719_s4 + $0x1] ss:$0 sm:$0xff]  ;;  %v363_v48 = vld [vmem:[%s719_s4 + $0x2] ss:$0 sm:$0xff] }
  0x41   :  { %426 = vmatprep.subr.mxu1 %v607_v0  ;;  %451 = vmatprep.subr.mxu0 %v607_v0 }
  0x42   :  { %427 = vmatpush3.msra.mxu1 %v168_v12  ;;  %452 = vmatpush3.msra.mxu0 %v265_v23 }
  0x43   :  { %428 = vmatprep.subr.mxu1 %v607_v0  ;;  %453 = vmatprep.subr.mxu0 %v607_v0 }
  0x44   :  { %429 = vmatpush3.msra.mxu1 %v167_v13  ;;  %454 = vmatpush3.msra.mxu0 %v264_v24 }
  0x45   :  { %430 = vmatprep.subr.mxu1 %v607_v0  ;;  %455 = vmatprep.subr.mxu0 %v607_v0 }
  0x46   :  { %431 = vmatpush3.msra.mxu1 %v166_v14  ;;  %456 = vmatpush3.msra.mxu0 %v263_v25 }
  0x47   :  { %432 = vmatprep.subr.mxu1 %v607_v0  ;;  %457 = vmatprep.subr.mxu0 %v607_v0 }
  0x48   :  { %433 = vmatpush3.msra.mxu1 %v165_v15  ;;  %458 = vmatpush3.msra.mxu0 %v262_v26 }
  0x49   :  { %434 = vmatprep.subr.mxu1 %v607_v0  ;;  %459 = vmatprep.subr.mxu0 %v607_v0 }
  0x4a   :  { %435 = vmatpush3.msra.mxu1 %v164_v16  ;;  %460 = vmatpush3.msra.mxu0 %v261_v27 }
  0x4b   :  { %436 = vmatprep.subr.mxu1 %v607_v0  ;;  %461 = vmatprep.subr.mxu0 %v607_v0 }
  0x4c   :  { %437 = vmatpush3.msra.mxu1 %v163_v17  ;;  %462 = vmatpush3.msra.mxu0 %v260_v28 }
  0x4d   :  { %438 = vmatprep.subr.mxu1 %v607_v0  ;;  %463 = vmatprep.subr.mxu0 %v607_v0 }
  0x4e   :  { %439 = vmatpush3.msra.mxu1 %v162_v18  ;;  %464 = vmatpush3.msra.mxu0 %v259_v29 }
  0x4f   :  { %440 = vmatprep.subr.mxu1 %v607_v0  ;;  %465 = vmatprep.subr.mxu0 %v607_v0 }
  0x50   :  { %441 = vmatpush3.msra.mxu1 %v161_v19  ;;  %466 = vmatpush3.msra.mxu0 %v258_v30 }
  0x51   :  { %442 = vmatprep.subr.mxu1 %v607_v0  ;;  %467 = vmatprep.subr.mxu0 %v607_v0 }
  0x52   :  { %443 = vmatpush3.msra.mxu1 %v160_v20  ;;  %468 = vmatpush3.msra.mxu0 %v257_v31 }
  0x53   :  { %444 = vmatprep.subr.mxu1 %v607_v0  ;;  %469 = vmatprep.subr.mxu0 %v607_v0 }
  0x54   :  { %445 = vmatpush3.msra.mxu1 %v159_v21  ;;  %470 = vmatpush3.msra.mxu0 %v256_v32 }
  0x55   :  { %471 = vmatprep.subr.mxu0 %v607_v0 }
  0x56   :  { %472 = vmatpush3.msra.mxu0 %v255_v33 }
  0x57   :  { %473 = vmatprep.subr.mxu0 %v607_v0 }
  0x58   :  { %474 = vmatpush3.msra.mxu0 %v254_v34 }
  0x59   :  { %475 = vmatprep.subr.mxu0 %v607_v0 }
  0x5a   :  { %476 = vmatpush3.msra.mxu0 %v253_v40 }
  0x5b   :  { %477 = vmatprep.subr.mxu0 %v607_v0 }
  0x5c   :  { %478 = vmatpush3.msra.mxu0 %v252_v41 }
  0x5d   :  { %479 = vmatprep.subr.mxu0 %v607_v0 }
  0x5e   :  { %480 = vmatpush3.msra.mxu0 %v251_v42 }
  0xfd   :  { %v154_v36 = vpop.f32.mrf.mxu0 }
  0xfe   :  { %v155_v37 = vadd.f32 %v360_v35, %v154_v36 }
  0xff   :  { %v413_v38 = vpop.f32.mrf.mxu0 }
 0x100   :  { %v158_v39 = vmax.f32 %v155_v37, 0.0 }
 0x102   :  { %447 = vmatmul.mubr.f32.vlgmr.msra.gmra.mxu1 %v158_v39 }
 0x1c2   :  { %v246_v44 = vpop.f32.mrf.mxu1 }
 0x1c3   :  { %v247_v45 = vadd.f32 %v362_v43, %v246_v44 }
 0x1c4   :  { %v448_v46 = vpop.f32.mrf.mxu1 }
 0x1c5   :  { %v250_v47 = vmax.f32 %v247_v45, 0.0 }
 0x1c7   :  { %482 = vmatmul.mubr.f32.vlgmr.msra.gmra.mxu0 %v250_v47 }
 0x287   :  { %v338_v49 = vpop.f32.mrf.mxu0 }
 0x288   :  { %v339_v50 = vadd.f32 %v363_v48, %v338_v49 }
 0x289   :  { %v483_v51 = vpop.f32.mrf.mxu0 }
 0x28a   :  { %342 = vst [vmem:[#allocation10] sm:$0xff] %v339_v50 }
 0x28b   :  { %584 = shalt.err (!%p581_p10)
}
 0x28c   :  { %352 = dma.vmem_to_hbm [thread:$0]  %s350_s18, 128, %s720_s5, [#allocation4]  }
 0x28d   :  { %599 = dma.done.wait [#allocation4], 128  }
 0x28e   :  { %600 = vsyncadd [#allocation4], 4294967168 }
 0x28f   :  { %356 = vsyncpa [#allocation3], 1 }
 0x290   :  { %357 = vsyncpa [#allocation6], 1 }
 0x291   :  { %358 = vsyncpa [#allocation9], 1 }
 0x292   :  { %359 = vsyncpa [#allocation4], 1 }

</bundles_post_ra>
